<compile_context>
chip_gen: v7x
topology: tpu7x:2x2x1
jax: 0.10.0
libtpu: 0.0.40
codegen_flags: <defaults>
</compile_context>

<pallas_src>
import functools

import jax
import jax.numpy as jnp
from jax.experimental import pallas as pl
from jax.experimental.pallas import tpu as pltpu


# --------------------------- per-generation tuning ---------------------------

def _tpu_settings():
    """Band cap / VMEM limit per TPU generation (v5/v6 have 128 MiB VMEM)."""
    kind = ""
    try:
        kind = jax.devices()[0].device_kind.lower()
    except Exception:
        pass
    if ("v5" in kind) or ("v6" in kind):
        return {"band_cap": 112, "vmem_limit": 96 * 1024 * 1024}
    # v7x (64 MiB VMEM) and anything unknown: stay conservative.
    return {"band_cap": 32, "vmem_limit": 48 * 1024 * 1024}


_SETTINGS = _tpu_settings()


# --------------------------- helpers -----------------------------------------

def _largest_divisor_leq(n, cap):
    """Largest divisor of n that is <= cap."""
    d = min(n, cap)
    while n % d:
        d -= 1
    return d


def _row_tile(r, cap=1024):
    """Row tile for the L1 reduction: a multiple of 8 dividing r, else r itself."""
    if r <= cap:
        return r
    t = (cap // 8) * 8
    while t >= 8:
        if r % t == 0:
            return t
        t -= 8
    return r


# --------------------------- Pallas kernels ----------------------------------

def _conv3x3_kernel(x_ref, w_ref, b_ref, o_ref, *, band, width, wc):
    """Implicit-GEMM 3x3 conv + bias + ReLU for one (row-band, Cout-tile).

    x_ref: (Hp, Wp, Cin)     bf16, full padded image, resident across (j, i)
    w_ref: (3, 3, Cin, TN)   bf16
    b_ref: (1, TN)           f32
    o_ref: (band, width, TN) bf16

    Per output row, the 9 taps are 9 MXU matmuls whose bf16 LHS is loaded with
    the (ky, kx) shift already applied, so each dot produces exactly the
    accumulator shape.  The width axis is processed in <=128-column chunks so
    acc + matmul result stay well inside the 64-vreg file.
    """
    r0 = pl.program_id(2) * band
    bias = b_ref[...]                              # (1, TN) f32
    tn = o_ref.shape[-1]
    n_chunks = width // wc

    def row_body(r, carry):
        row = r0 + r
        # Static chunk loop: for W=224 layers this also gives the scheduler two
        # independent acc chains per row (chunk-c epilogue overlaps chunk-c+1
        # matmuls) -- the useful part of row unrolling without doubling vregs.
        for c in range(n_chunks):
            col0 = c * wc
            acc = jnp.zeros((wc, tn), jnp.float32)
            for ky in range(3):
                for kx in range(3):
                    # shifted bf16 load; kx / col0 are static, row is dynamic
                    xs = x_ref[row + ky, pl.ds(col0 + kx, wc), :]   # (wc, Cin)
                    acc = acc + jnp.dot(xs, w_ref[ky, kx],
                                        preferred_element_type=jnp.float32)
            o_ref[r, pl.ds(col0, wc), :] = jnp.maximum(acc + bias, 0.0).astype(o_ref.dtype)
        return carry

    jax.lax.fori_loop(0, band, row_body, 0)


def _l1_kernel(x_ref, y_ref, o_ref, acc_ref, *, inv_count, rows8):
    """Tiled mean(|x - y|): partial sums accumulate into an (8, C) f32 VMEM
    slab (pure vreg adds); single cross-lane reduce on the last grid step."""
    @pl.when(pl.program_id(0) == 0)
    def _init():
        acc_ref[...] = jnp.zeros_like(acc_ref)

    d = jnp.abs(x_ref[...].astype(jnp.float32) - y_ref[...].astype(jnp.float32))
    tr, c = d.shape
    if rows8:
        acc_ref[...] += d.reshape(tr // 8, 8, c).sum(axis=0)
    else:  # fallback for tiles not divisible by 8 (not hit for VGG shapes)
        acc_ref[0:1, :] += d.sum(axis=0, keepdims=True)

    @pl.when(pl.program_id(0) == pl.num_programs(0) - 1)
    def _finalize():
        o_ref[0, 0] = jnp.sum(acc_ref[...]) * inv_count


# --------------------------- Pallas wrappers ---------------------------------

def conv3x3_relu(x_nhwc, w_hwio, bias):
    """3x3 conv, stride 1, pad 1, fused bias + ReLU (implicit GEMM on the MXU)."""
    N, H, W, Cin = x_nhwc.shape
    Cout = w_hwio.shape[-1]

    # Pad channels to a multiple of 8 (conv1: 3 -> 8) and add the 1-pixel
    # spatial halo.  Activations / weights travel as bf16 (f32 MXU accumulation).
    # TODO(synk): conv1 (Cin=3) could be special-cased as an im2col GEMM to avoid
    # its lane-padded resident image; it is <1% of FLOPs and still fits VMEM.
    cpad = (-Cin) % 8
    xp = jnp.pad(x_nhwc, ((0, 0), (1, 1), (1, 1), (0, cpad))).astype(jnp.bfloat16)
    w = jnp.pad(w_hwio, ((0, 0), (0, 0), (0, cpad), (0, 0))).astype(jnp.bfloat16)
    b = bias.reshape(1, Cout).astype(jnp.float32)
    Cin_p = Cin + cpad

    # TN=128: matches v5e's MXU width and keeps the f32 accumulator small enough
    # to avoid spills on every generation (v6e/v7x could use TN=256 + deeper
    # width sub-tiling; 128 is the safe common choice).
    TN = min(Cout, 128)
    band = _largest_divisor_leq(H, _SETTINGS["band_cap"])   # output rows / grid step
    wc = _largest_divisor_leq(W, 128)                       # width sub-tile
    grid = (N, Cout // TN, H // band)

    kernel = functools.partial(_conv3x3_kernel, band=band, width=W, wc=wc)

    out = pl.pallas_call(
        kernel,
        out_shape=jax.ShapeDtypeStruct((N, H, W, Cout), jnp.bfloat16),
        grid_spec=pltpu.PrefetchScalarGridSpec(
            num_scalar_prefetch=0,
            grid=grid,
            in_specs=[
                # whole padded image stays resident in VMEM across (j, i)
                pl.BlockSpec((None, H + 2, W + 2, Cin_p),
                             lambda n, j, i: (n, 0, 0, 0)),
                pl.BlockSpec((3, 3, Cin_p, TN), lambda n, j, i: (0, 0, 0, j)),
                pl.BlockSpec((1, TN), lambda n, j, i: (0, j)),
            ],
            out_specs=pl.BlockSpec((None, band, W, TN),
                                   lambda n, j, i: (n, i, 0, j)),
        ),
        compiler_params=pltpu.CompilerParams(
            # every (n, j, i) block is independent -> all axes parallel, so
            # v7x's two TensorCores can also split the row-band axis.
            dimension_semantics=("parallel", "parallel", "parallel"),
            vmem_limit_bytes=_SETTINGS["vmem_limit"],
        ),
    )(xp, w, b)
    return out


def l1_loss(x, y):
    """mean(|x - y|) over all elements (== torch.nn.functional.l1_loss)."""
    C = x.shape[-1]
    xf = x.reshape(-1, C)
    yf = y.reshape(-1, C)
    R = xf.shape[0]
    TR = _row_tile(R)
    inv = 1.0 / float(x.size)
    out = pl.pallas_call(
        functools.partial(_l1_kernel, inv_count=inv, rows8=(TR % 8 == 0)),
        out_shape=jax.ShapeDtypeStruct((1, 1), jnp.float32),
        grid_spec=pltpu.PrefetchScalarGridSpec(
            num_scalar_prefetch=0,
            grid=(R // TR,),
            in_specs=[pl.BlockSpec((TR, C), lambda i: (i, 0)),
                      pl.BlockSpec((TR, C), lambda i: (i, 0))],
            out_specs=pl.BlockSpec((1, 1), lambda i: (0, 0),
                                   memory_space=pltpu.MemorySpace.SMEM),
            scratch_shapes=[pltpu.VMEM((8, C), jnp.float32)],
        ),
        compiler_params=pltpu.CompilerParams(
            dimension_semantics=("arbitrary",)),
    )(xf, yf)
    return out[0, 0]


def maxpool2x2(x_nhwc):
    # Glue: 2x2 / stride-2 max pool with floor semantics (matches torch MaxPool2d).
    # TODO(synk): fusing this into the conv epilogue would save an HBM round trip
    # per block boundary; kept as an XLA reshape+max for simplicity.
    N, H, W, C = x_nhwc.shape
    H2, W2 = H // 2, W // 2
    x = x_nhwc[:, :H2 * 2, :W2 * 2, :]
    return x.reshape(N, H2, 2, W2, 2, C).max(axis=(2, 4))


# --------------------------- Module port -------------------------------------

class VGGContentLoss:
    """JAX/Pallas port of the PyTorch VGGContentLoss module."""

    # VGG16 features[:23] conv structure, grouped exactly like the torch blocks:
    #   block0 = features[:4]    conv(3,64)   conv(64,64)
    #   block1 = features[4:9]   pool conv(64,128)  conv(128,128)
    #   block2 = features[9:16]  pool conv(128,256) conv(256,256) conv(256,256)
    #   block3 = features[16:23] pool conv(256,512) conv(512,512) conv(512,512)
    _CFG = [
        [(3, 64), (64, 64)],
        [(64, 128), (128, 128)],
        [(128, 256), (256, 256), (256, 256)],
        [(256, 512), (512, 512), (512, 512)],
    ]

    def __init__(self, resize=True, seed=42):
        key = jax.random.PRNGKey(seed)
        mean = jnp.array([0.485, 0.456, 0.406], jnp.float32)
        std = jnp.array([0.229, 0.224, 0.225], jnp.float32)
        blocks = []
        for block_cfg in self._CFG:
            params = []
            for (cin, cout) in block_cfg:
                key, kw = jax.random.split(key)
                scale = (2.0 / (9 * cin)) ** 0.5
                w = scale * jax.random.normal(kw, (3, 3, cin, cout), jnp.float32)  # HWIO
                b = jnp.zeros((cout,), jnp.float32)
                params.append((w, b))
            blocks.append(params)
        # Fold the ImageNet normalization (x - mean) / std into conv1:
        #   conv(w, b)((x - m) / s) == conv(w / s, b - sum_k w_k * m / s)(x)
        # (valid because the bilinear resize is linear, so it commutes).
        w1, b1 = blocks[0][0]
        w1f = w1 / std[None, None, :, None]
        b1f = b1 - jnp.einsum('hwio,i->o', w1, mean / std)
        blocks[0][0] = (w1f, b1f)
        self.blocks = blocks
        self.resize = resize

    def _run_block(self, i, x):
        if i > 0:
            x = maxpool2x2(x)
        for (w, b) in self.blocks[i]:
            x = conv3x3_relu(x, w, b)
        return x

    def __call__(self, input_nchw, target_nchw, feature_layers=(2,),
                 style_weight=0.001, content_weight=0.001):
        # style_weight is accepted but unused, exactly like the reference module.
        # repeat to 3 channels if needed (same semantics as .repeat(1, 3, 1, 1))
        if input_nchw.shape[1] != 3:
            input_nchw = jnp.tile(input_nchw, (1, 3, 1, 1))
            target_nchw = jnp.tile(target_nchw, (1, 3, 1, 1))
        B = input_nchw.shape[0]

        # Batch input & target together so the backbone runs once per layer,
        # and go NCHW -> NHWC (channels land on the 128-lane axis).
        xy = jnp.concatenate([input_nchw, target_nchw], axis=0)
        xy = jnp.transpose(xy, (0, 2, 3, 1)).astype(jnp.float32)

        # Normalization is folded into conv1 (commutes with bilinear resize).
        if self.resize:
            # TODO(synk): bilinear resize stays an XLA op (no clean Pallas equivalent).
            xy = jax.image.resize(xy, (xy.shape[0], 224, 224, 3), method="bilinear")

        loss = jnp.float32(0.0)
        if len(feature_layers) == 0:
            return loss
        # Only run the blocks whose features are actually consumed: with the
        # default feature_layers=(2,) block3 is skipped entirely (its output
        # never contributed to the loss in the reference module either).
        last_block = min(len(self.blocks) - 1, max(feature_layers))
        feat = xy
        for i in range(last_block + 1):
            feat = self._run_block(i, feat)
            if i in feature_layers:
                loss = loss + content_weight * l1_loss(feat[:B], feat[B:])
        return loss


# --------------------------- Demo --------------------------------------------

if __name__ == "__main__":
    key = jax.random.PRNGKey(0)
    k1, k2 = jax.random.split(key)
    inp = jax.random.uniform(k1, (2, 3, 32, 32), jnp.float32)
    tgt = jax.random.uniform(k2, (2, 3, 32, 32), jnp.float32)

    # resize=False keeps the demo at small spatial sizes (module supports it).
    loss_module = VGGContentLoss(resize=False)
    loss = loss_module(inp, tgt)
    loss = jax.block_until_ready(loss)
    assert jnp.isfinite(loss), "loss is not finite"
    print("KERNEL_OK")
</pallas_src>

<mosaic_0001>
module attributes {stable_mosaic.version = 11 : i64} {
  func.func @_conv3x3_kernel(%arg0: i32, %arg1: i32, %arg2: i32, %arg3: memref<1x34x34x8xbf16, #tpu.memory_space<vmem>>, %arg4: memref<3x3x8x64xbf16, #tpu.memory_space<vmem>>, %arg5: memref<1x64xf32, #tpu.memory_space<vmem>>, %arg6: memref<1x32x32x64xbf16, #tpu.memory_space<vmem>>) attributes {dimension_semantics = [#tpu.dimension_semantics<parallel>, #tpu.dimension_semantics<parallel>, #tpu.dimension_semantics<parallel>], iteration_bounds = array<i64: 4, 1, 1>, scalar_prefetch = 0 : i64, scratch_operands = 0 : i64, tpu.core_type = #tpu.core_type<tc>, window_params = [{transform_indices = @transform_0, window_bounds = array<i64: 1, 34, 34, 8>}, {transform_indices = @transform_1, window_bounds = array<i64: 3, 3, 8, 64>}, {transform_indices = @transform_2, window_bounds = array<i64: 1, 64>}, {transform_indices = @transform_3, window_bounds = array<i64: 1, 32, 32, 64>}]} {
    %c32_i32 = arith.constant 32 : i32
    %0 = arith.muli %arg2, %c32_i32 : i32
    %c0 = arith.constant 0 : index
    %c0_0 = arith.constant 0 : index
    %1 = vector.load %arg5[%c0, %c0_0] : memref<1x64xf32, #tpu.memory_space<vmem>>, vector<1x64xf32>
    %c0_i32 = arith.constant 0 : i32
    %c32_i32_1 = arith.constant 32 : i32
    %2 = arith.addi %c0_i32, %c32_i32_1 : i32
    %c1_i32 = arith.constant 1 : i32
    scf.for %arg7 = %c0_i32 to %2 step %c1_i32  : i32 {
      %3 = arith.addi %0, %arg7 : i32
      %cst = arith.constant 0.000000e+00 : f32
      %4 = vector.broadcast %cst : f32 to vector<32x64xf32>
      %c0_i32_3 = arith.constant 0 : i32
      %5 = arith.addi %3, %c0_i32_3 : i32
      %c0_4 = arith.constant 0 : index
      %6 = arith.index_cast %5 : i32 to index
      %c0_5 = arith.constant 0 : index
      %c0_6 = arith.constant 0 : index
      %7 = vector.load %arg3[%c0_4, %6, %c0_5, %c0_6] : memref<1x34x34x8xbf16, #tpu.memory_space<vmem>>, vector<1x1x32x8xbf16>
      %8 = vector.shape_cast %7 : vector<1x1x32x8xbf16> to vector<32x8xbf16>
      %c0_7 = arith.constant 0 : index
      %c0_8 = arith.constant 0 : index
      %c0_9 = arith.constant 0 : index
      %c0_10 = arith.constant 0 : index
      %9 = vector.load %arg4[%c0_7, %c0_8, %c0_9, %c0_10] : memref<3x3x8x64xbf16, #tpu.memory_space<vmem>>, vector<1x1x8x64xbf16>
      %10 = vector.shape_cast %9 : vector<1x1x8x64xbf16> to vector<8x64xbf16>
      %cst_11 = arith.constant dense<0.000000e+00> : vector<32x64xf32>
      %11 = tpu.matmul %8, %10, %cst_11 {dimension_numbers = #tpu.dot_dimension_numbers<[1], [0], [0], [1], [0, 0, 1, 1], [], []>} : vector<32x8xbf16>, vector<8x64xbf16>, vector<32x64xf32> -> vector<32x64xf32>
      %12 = arith.addf %4, %11 : vector<32x64xf32>
      %c0_i32_12 = arith.constant 0 : i32
      %13 = arith.addi %3, %c0_i32_12 : i32
      %c0_13 = arith.constant 0 : index
      %14 = arith.index_cast %13 : i32 to index
      %c1 = arith.constant 1 : index
      %c0_14 = arith.constant 0 : index
      %15 = vector.load %arg3[%c0_13, %14, %c1, %c0_14] : memref<1x34x34x8xbf16, #tpu.memory_space<vmem>>, vector<1x1x32x8xbf16>
      %16 = vector.shape_cast %15 : vector<1x1x32x8xbf16> to vector<32x8xbf16>
      %c0_15 = arith.constant 0 : index
      %c1_16 = arith.constant 1 : index
      %c0_17 = arith.constant 0 : index
      %c0_18 = arith.constant 0 : index
      %17 = vector.load %arg4[%c0_15, %c1_16, %c0_17, %c0_18] : memref<3x3x8x64xbf16, #tpu.memory_space<vmem>>, vector<1x1x8x64xbf16>
      %18 = vector.shape_cast %17 : vector<1x1x8x64xbf16> to vector<8x64xbf16>
      %cst_19 = arith.constant dense<0.000000e+00> : vector<32x64xf32>
      %19 = tpu.matmul %16, %18, %cst_19 {dimension_numbers = #tpu.dot_dimension_numbers<[1], [0], [0], [1], [0, 0, 1, 1], [], []>} : vector<32x8xbf16>, vector<8x64xbf16>, vector<32x64xf32> -> vector<32x64xf32>
      %20 = arith.addf %12, %19 : vector<32x64xf32>
      %c0_i32_20 = arith.constant 0 : i32
      %21 = arith.addi %3, %c0_i32_20 : i32
      %c0_21 = arith.constant 0 : index
      %22 = arith.index_cast %21 : i32 to index
      %c2 = arith.constant 2 : index
      %c0_22 = arith.constant 0 : index
      %23 = vector.load %arg3[%c0_21, %22, %c2, %c0_22] : memref<1x34x34x8xbf16, #tpu.memory_space<vmem>>, vector<1x1x32x8xbf16>
      %24 = vector.shape_cast %23 : vector<1x1x32x8xbf16> to vector<32x8xbf16>
      %c0_23 = arith.constant 0 : index
      %c2_24 = arith.constant 2 : index
      %c0_25 = arith.constant 0 : index
      %c0_26 = arith.constant 0 : index
      %25 = vector.load %arg4[%c0_23, %c2_24, %c0_25, %c0_26] : memref<3x3x8x64xbf16, #tpu.memory_space<vmem>>, vector<1x1x8x64xbf16>
      %26 = vector.shape_cast %25 : vector<1x1x8x64xbf16> to vector<8x64xbf16>
      %cst_27 = arith.constant dense<0.000000e+00> : vector<32x64xf32>
      %27 = tpu.matmul %24, %26, %cst_27 {dimension_numbers = #tpu.dot_dimension_numbers<[1], [0], [0], [1], [0, 0, 1, 1], [], []>} : vector<32x8xbf16>, vector<8x64xbf16>, vector<32x64xf32> -> vector<32x64xf32>
      %28 = arith.addf %20, %27 : vector<32x64xf32>
      %c1_i32_28 = arith.constant 1 : i32
      %29 = arith.addi %3, %c1_i32_28 : i32
      %c0_29 = arith.constant 0 : index
      %30 = arith.index_cast %29 : i32 to index
      %c0_30 = arith.constant 0 : index
      %c0_31 = arith.constant 0 : index
      %31 = vector.load %arg3[%c0_29, %30, %c0_30, %c0_31] : memref<1x34x34x8xbf16, #tpu.memory_space<vmem>>, vector<1x1x32x8xbf16>
      %32 = vector.shape_cast %31 : vector<1x1x32x8xbf16> to vector<32x8xbf16>
      %c1_32 = arith.constant 1 : index
      %c0_33 = arith.constant 0 : index
      %c0_34 = arith.constant 0 : index
      %c0_35 = arith.constant 0 : index
      %33 = vector.load %arg4[%c1_32, %c0_33, %c0_34, %c0_35] : memref<3x3x8x64xbf16, #tpu.memory_space<vmem>>, vector<1x1x8x64xbf16>
      %34 = vector.shape_cast %33 : vector<1x1x8x64xbf16> to vector<8x64xbf16>
      %cst_36 = arith.constant dense<0.000000e+00> : vector<32x64xf32>
      %35 = tpu.matmul %32, %34, %cst_36 {dimension_numbers = #tpu.dot_dimension_numbers<[1], [0], [0], [1], [0, 0, 1, 1], [], []>} : vector<32x8xbf16>, vector<8x64xbf16>, vector<32x64xf32> -> vector<32x64xf32>
      %36 = arith.addf %28, %35 : vector<32x64xf32>
      %c1_i32_37 = arith.constant 1 : i32
      %37 = arith.addi %3, %c1_i32_37 : i32
      %c0_38 = arith.constant 0 : index
      %38 = arith.index_cast %37 : i32 to index
      %c1_39 = arith.constant 1 : index
      %c0_40 = arith.constant 0 : index
      %39 = vector.load %arg3[%c0_38, %38, %c1_39, %c0_40] : memref<1x34x34x8xbf16, #tpu.memory_space<vmem>>, vector<1x1x32x8xbf16>
      %40 = vector.shape_cast %39 : vector<1x1x32x8xbf16> to vector<32x8xbf16>
      %c1_41 = arith.constant 1 : index
      %c1_42 = arith.constant 1 : index
      %c0_43 = arith.constant 0 : index
      %c0_44 = arith.constant 0 : index
      %41 = vector.load %arg4[%c1_41, %c1_42, %c0_43, %c0_44] : memref<3x3x8x64xbf16, #tpu.memory_space<vmem>>, vector<1x1x8x64xbf16>
      %42 = vector.shape_cast %41 : vector<1x1x8x64xbf16> to vector<8x64xbf16>
      %cst_45 = arith.constant dense<0.000000e+00> : vector<32x64xf32>
      %43 = tpu.matmul %40, %42, %cst_45 {dimension_numbers = #tpu.dot_dimension_numbers<[1], [0], [0], [1], [0, 0, 1, 1], [], []>} : vector<32x8xbf16>, vector<8x64xbf16>, vector<32x64xf32> -> vector<32x64xf32>
      %44 = arith.addf %36, %43 : vector<32x64xf32>
      %c1_i32_46 = arith.constant 1 : i32
      %45 = arith.addi %3, %c1_i32_46 : i32
      %c0_47 = arith.constant 0 : index
      %46 = arith.index_cast %45 : i32 to index
      %c2_48 = arith.constant 2 : index
      %c0_49 = arith.constant 0 : index
      %47 = vector.load %arg3[%c0_47, %46, %c2_48, %c0_49] : memref<1x34x34x8xbf16, #tpu.memory_space<vmem>>, vector<1x1x32x8xbf16>
      %48 = vector.shape_cast %47 : vector<1x1x32x8xbf16> to vector<32x8xbf16>
      %c1_50 = arith.constant 1 : index
      %c2_51 = arith.constant 2 : index
      %c0_52 = arith.constant 0 : index
      %c0_53 = arith.constant 0 : index
      %49 = vector.load %arg4[%c1_50, %c2_51, %c0_52, %c0_53] : memref<3x3x8x64xbf16, #tpu.memory_space<vmem>>, vector<1x1x8x64xbf16>
      %50 = vector.shape_cast %49 : vector<1x1x8x64xbf16> to vector<8x64xbf16>
      %cst_54 = arith.constant dense<0.000000e+00> : vector<32x64xf32>
      %51 = tpu.matmul %48, %50, %cst_54 {dimension_numbers = #tpu.dot_dimension_numbers<[1], [0], [0], [1], [0, 0, 1, 1], [], []>} : vector<32x8xbf16>, vector<8x64xbf16>, vector<32x64xf32> -> vector<32x64xf32>
      %52 = arith.addf %44, %51 : vector<32x64xf32>
      %c2_i32 = arith.constant 2 : i32
      %53 = arith.addi %3, %c2_i32 : i32
      %c0_55 = arith.constant 0 : index
      %54 = arith.index_cast %53 : i32 to index
      %c0_56 = arith.constant 0 : index
      %c0_57 = arith.constant 0 : index
      %55 = vector.load %arg3[%c0_55, %54, %c0_56, %c0_57] : memref<1x34x34x8xbf16, #tpu.memory_space<vmem>>, vector<1x1x32x8xbf16>
      %56 = vector.shape_cast %55 : vector<1x1x32x8xbf16> to vector<32x8xbf16>
      %c2_58 = arith.constant 2 : index
      %c0_59 = arith.constant 0 : index
      %c0_60 = arith.constant 0 : index
      %c0_61 = arith.constant 0 : index
      %57 = vector.load %arg4[%c2_58, %c0_59, %c0_60, %c0_61] : memref<3x3x8x64xbf16, #tpu.memory_space<vmem>>, vector<1x1x8x64xbf16>
      %58 = vector.shape_cast %57 : vector<1x1x8x64xbf16> to vector<8x64xbf16>
      %cst_62 = arith.constant dense<0.000000e+00> : vector<32x64xf32>
      %59 = tpu.matmul %56, %58, %cst_62 {dimension_numbers = #tpu.dot_dimension_numbers<[1], [0], [0], [1], [0, 0, 1, 1], [], []>} : vector<32x8xbf16>, vector<8x64xbf16>, vector<32x64xf32> -> vector<32x64xf32>
      %60 = arith.addf %52, %59 : vector<32x64xf32>
      %c2_i32_63 = arith.constant 2 : i32
      %61 = arith.addi %3, %c2_i32_63 : i32
      %c0_64 = arith.constant 0 : index
      %62 = arith.index_cast %61 : i32 to index
      %c1_65 = arith.constant 1 : index
      %c0_66 = arith.constant 0 : index
      %63 = vector.load %arg3[%c0_64, %62, %c1_65, %c0_66] : memref<1x34x34x8xbf16, #tpu.memory_space<vmem>>, vector<1x1x32x8xbf16>
      %64 = vector.shape_cast %63 : vector<1x1x32x8xbf16> to vector<32x8xbf16>
      %c2_67 = arith.constant 2 : index
      %c1_68 = arith.constant 1 : index
      %c0_69 = arith.constant 0 : index
      %c0_70 = arith.constant 0 : index
      %65 = vector.load %arg4[%c2_67, %c1_68, %c0_69, %c0_70] : memref<3x3x8x64xbf16, #tpu.memory_space<vmem>>, vector<1x1x8x64xbf16>
      %66 = vector.shape_cast %65 : vector<1x1x8x64xbf16> to vector<8x64xbf16>
      %cst_71 = arith.constant dense<0.000000e+00> : vector<32x64xf32>
      %67 = tpu.matmul %64, %66, %cst_71 {dimension_numbers = #tpu.dot_dimension_numbers<[1], [0], [0], [1], [0, 0, 1, 1], [], []>} : vector<32x8xbf16>, vector<8x64xbf16>, vector<32x64xf32> -> vector<32x64xf32>
      %68 = arith.addf %60, %67 : vector<32x64xf32>
      %c2_i32_72 = arith.constant 2 : i32
      %69 = arith.addi %3, %c2_i32_72 : i32
      %c0_73 = arith.constant 0 : index
      %70 = arith.index_cast %69 : i32 to index
      %c2_74 = arith.constant 2 : index
      %c0_75 = arith.constant 0 : index
      %71 = vector.load %arg3[%c0_73, %70, %c2_74, %c0_75] : memref<1x34x34x8xbf16, #tpu.memory_space<vmem>>, vector<1x1x32x8xbf16>
      %72 = vector.shape_cast %71 : vector<1x1x32x8xbf16> to vector<32x8xbf16>
      %c2_76 = arith.constant 2 : index
      %c2_77 = arith.constant 2 : index
      %c0_78 = arith.constant 0 : index
      %c0_79 = arith.constant 0 : index
      %73 = vector.load %arg4[%c2_76, %c2_77, %c0_78, %c0_79] : memref<3x3x8x64xbf16, #tpu.memory_space<vmem>>, vector<1x1x8x64xbf16>
      %74 = vector.shape_cast %73 : vector<1x1x8x64xbf16> to vector<8x64xbf16>
      %cst_80 = arith.constant dense<0.000000e+00> : vector<32x64xf32>
      %75 = tpu.matmul %72, %74, %cst_80 {dimension_numbers = #tpu.dot_dimension_numbers<[1], [0], [0], [1], [0, 0, 1, 1], [], []>} : vector<32x8xbf16>, vector<8x64xbf16>, vector<32x64xf32> -> vector<32x64xf32>
      %76 = arith.addf %68, %75 : vector<32x64xf32>
      %77 = vector.broadcast %1 : vector<1x64xf32> to vector<32x64xf32>
      %78 = arith.addf %76, %77 : vector<32x64xf32>
      %cst_81 = arith.constant 0.000000e+00 : f32
      %79 = vector.broadcast %cst_81 : f32 to vector<32x64xf32>
      %80 = arith.maximumf %78, %79 : vector<32x64xf32>
      %81 = arith.truncf %80 : vector<32x64xf32> to vector<32x64xbf16>
      %c0_82 = arith.constant 0 : index
      %82 = arith.index_cast %arg7 : i32 to index
      %c0_83 = arith.constant 0 : index
      %c0_84 = arith.constant 0 : index
      %83 = vector.load %arg6[%c0_82, %82, %c0_83, %c0_84] : memref<1x32x32x64xbf16, #tpu.memory_space<vmem>>, vector<1x1x32x64xbf16>
      %84 = vector.shape_cast %83 : vector<1x1x32x64xbf16> to vector<32x64xbf16>
      %85 = vector.shape_cast %81 : vector<32x64xbf16> to vector<1x1x32x64xbf16>
      tpu.vector_store %arg6[%c0_82, %82, %c0_83, %c0_84], %85 {strides = array<i32>} : memref<1x32x32x64xbf16, #tpu.memory_space<vmem>>, vector<1x1x32x64xbf16>,
    }
    %c32_i32_2 = arith.constant 32 : i32
    return
  }
  func.func @transform_0(%arg0: i32, %arg1: i32, %arg2: i32) -> (i32, i32, i32, i32) {
    %c0_i32 = arith.constant 0 : i32
    %c0_i32_0 = arith.constant 0 : i32
    %c0_i32_1 = arith.constant 0 : i32
    %c0_i32_2 = arith.constant 0 : i32
    return %arg0, %c0_i32, %c0_i32_0, %c0_i32_1 : i32, i32, i32, i32
  }
  func.func @transform_1(%arg0: i32, %arg1: i32, %arg2: i32) -> (i32, i32, i32, i32) {
    %c0_i32 = arith.constant 0 : i32
    %c0_i32_0 = arith.constant 0 : i32
    %c0_i32_1 = arith.constant 0 : i32
    %c0_i32_2 = arith.constant 0 : i32
    return %c0_i32, %c0_i32_0, %c0_i32_1, %arg1 : i32, i32, i32, i32
  }
  func.func @transform_2(%arg0: i32, %arg1: i32, %arg2: i32) -> (i32, i32) {
    %c0_i32 = arith.constant 0 : i32
    %c0_i32_0 = arith.constant 0 : i32
    return %c0_i32, %arg1 : i32, i32
  }
  func.func @transform_3(%arg0: i32, %arg1: i32, %arg2: i32) -> (i32, i32, i32, i32) {
    %c0_i32 = arith.constant 0 : i32
    %c0_i32_0 = arith.constant 0 : i32
    return %arg0, %arg2, %c0_i32, %arg1 : i32, i32, i32, i32
  }
}

</mosaic_0001>

<bundles_post_ra>
// kernel: tpu_custom_call.1
= control target key start
LH: loop header
LB: loop body
LE: loop exit
PB: predicated region body
PF: predicated region fallthrough
CT: control target
= control target key end

     0   :  { %8 = vsyncpa [#allocation3], 0  ;;  %s1824_s0 = inlined_call_operand.vmem [shape: bf16[4,34,34,8], index: 0, kind: input, shape index: {}]   ;;  %s1825_s1 = inlined_call_operand.vmem [shape: bf16[3,3,8,64], index: 1, kind: input, shape index: {}]   ;;  %s1826_s2 = inlined_call_operand.vmem [shape: f32[1,64], index: 2, kind: input, shape index: {}]   ;;  %s1827_s3 = inlined_call_operand.hbm [shape: bf16[4,32,32,64], index: 3, kind: output, shape index: {}]  }
   0x1   :  { %10 = vsyncpa [#allocation3 + $0x1], 0  ;;  %s1570_s12 = smov 0   ;;  %s1572_s13 = smov 0  }
   0x2   :  { %s1574_s14 = smov 0   ;;  %s1576_s15 = smov 0  }
   0x3   :  { %s1578_s16 = smov 0   ;;  %s1580_s17 = smov 0  }
   0x4 LB: > { %s1164_s18 = sadd.s32 4294967295, %s1541_s17   ;;  %s1165_s19 = sadd.s32 4294967294, %s1541_s17   ;;  %s1541_s17 = sphi %s1580_s17, %s16_s17   ;;  %s1537_s16 = sphi %s1578_s16, %s1834_s16   ;;  %s1533_s15 = sphi %s1576_s15, %s1833_s15   ;;  %s1529_s14 = sphi %s1574_s14, %s1832_s14   ;;  %s1525_s13 = sphi %s1572_s13, %s1831_s13   ;;  %s1521_s12 = sphi %s1570_s12, %s1830_s12  }
   0x5   : > { %s35_s20 = sadd.s32 1, %s1537_s16  ;;  %s124_s21 = sadd.s32 1, %s1529_s14 }
   0x6   : > { %p37_p0 = scmp.ge.s32.totalorder %s35_s20, 4  ;;  %p134_p1 = scmp.ne.s32.totalorder %s1529_s14, %s1525_s13 }
   0x7   : > { %p135_p2 = scmp.eq.s32.totalorder %s1164_s18, 3  ;;  %p140_p3 = scmp.ne.s32.totalorder %s1525_s13, %s1521_s12 }
   0x8   : > { %s1836_s20 = smov (%p37_p0, %s35_s20), 0  ;;  %p141_p5 = scmp.eq.s32.totalorder %s1165_s19, 3 }
   0x9   : > { %p1610_p4 = por %p135_p2, %p134_p1  ;;  %s117_s23 = ssub.s32 %s1537_s16, %s1836_s20 }
   0xa   : > { %p1170_p6 = scmp.ge.s32.totalorder %s1541_s17, 1  ;;  %p122_p7 = scmp.eq.s32.totalorder %s117_s23, 0 }
   0xb   : > { %p1617_p8 = por %p141_p5, %p140_p3  ;;  %p180_p9 = scmp.lt.s32.totalorder %s1541_s17, 5 }
   0xc   : > { %s1623_s25 = scalar_select %p122_p7, %s1529_s14, %s124_s21  }
   0xd   : > { %p181_p10 = pnand %p1170_p6, %p180_p9 }
   0xe   : > { %s208_s26 = sand.u32 (!%p181_p10), 1, %s1525_s13   ;;  %p211_p11 = scmp.lt.s32.totalorder (!%p181_p10), %s1533_s15, 3  ;;  %v1630_v0 = vld [vmem:[%s1826_s2] ss:$0 sm:$0xff] (!%p181_p10) }
   0xf   : > { %184 = sbr.rel (%p181_p10) target bundleno = 329 (0x149), region = 32  ;;  %s1634_s29 = sshll.u32 (!%p181_p10), %s208_s26, 9 }
  0x10   : > { %s210_s8 = scalar_lea.vmem (!%p181_p10), [#allocation2], %s1634_s29  ;;  %s1643_s9 = smov (!%p181_p10), 0  }
  0x16   : > { %s212_s30 = scalar_select %p211_p11, %s1533_s15, 3 }
  0x18   : > { %s1377_s4 = smul.u32 680, %s212_s30 }
  0x1a   : > { %s1640_s7 = scalar_lea.vmem %s1824_s0, %s1377_s4 }
  0x1b LB: >> { %vm286_vm0 = vcmask 1043456   ;;  %v1200_v1 = vld [vmem:[%s1825_s1 + $0x10] sm:$0xf]  ;;  %v1174_v2 = vld [vmem:[%s1825_s1 + $0x4] sm:$0xf]  ;;  %s1248_s27 = smul.u32 20, %s1545_s9  ;;  %s1545_s9 = sphi %s1643_s9, %s232_s9  }
  0x1c   : >> { %1372 = vmatprep.subr.msk.bf16.mxu0 %vm286_vm0, %v1200_v1  ;;  %1368 = vmatprep.subr.msk.bf16.mxu1 %vm286_vm0, %v1174_v2  ;;  %v598_v3 = vsel %vm286_vm0, %v1200_v1, 0  ;;  %v288_v4 = vsel %vm286_vm0, %v1174_v2, 0  ;;  %v1207_v5 = vld [vmem:[%s1825_s1 + $0x14] sm:$0xf]  ;;  %v241_v6 = vld [vmem:[%s1825_s1] sm:$0xf] }
  0x1d   : >> { %1307 = vmatpush3.bf16.msra.mxu0 %v598_v3  ;;  %1283 = vmatpush3.bf16.msra.mxu1 %v288_v4  ;;  %s1668_s4 = scalar_lea.vmem %s1640_s7, %s1248_s27  ;;  %vm258_vm1 = vsmask.f32 7424  ;;  %vm279_vm2 = vcmask 64512   ;;  %vm401_vm3 = vcmask 1046528   ;;  %v344_v20 = vsel %vm286_vm0, %v241_v6, 0  ;;  %s1253_s30 = sshll.u32 %s1545_s9, 4 }
  0x1e   : >> { %1373 = vmatprep.subr.msk.bf16.mxu0 %vm286_vm0, %v1207_v5  ;;  %1369 = vmatprep.subr.msk.bf16.mxu1 %vm286_vm0, %v241_v6  ;;  %v237_v7 = vld [vmem:[%s1668_s4] sm:$0xf]  ;;  %v238_v8 = vld [vmem:[%s1668_s4 + $0x4] sm:$0xf]  ;;  %v1673_v10 = vld [vmem:[%s1668_s4 + $0x8] sm:$0xff]   ;;  %v671_v48 = vsel %vm286_vm0, %v1207_v5, 0 }
  0x1f   : >> { %v1175_v9 = vcombine.low %v237_v7, %v238_v8  ;;  %v1195_v11 = vld [vmem:[%s1668_s4 + $0x14] sm:$0xf]  ;;  %v1196_v12 = vld [vmem:[%s1668_s4 + $0x18] sm:$0xf]  ;;  %v267_v15 = vshll.u32 %v1673_v10, 16  ;;  %v271_v16 = vshrl.u32 %v1673_v10, 16 }
  0x20   : >> { %v1446_v17 = vld [vmem:[%s1668_s4 + $0x1c] sm:$0xff]   ;;  %v1201_v18 = vcombine.low %v1195_v11, %v1196_v12  ;;  %v1681_v19 = vld [vmem:[%s1668_s4 + $0x10] ss:$0 sps:$4 sm:$0x11]   ;;  %v1206_v32 = vld [vmem:[%s1668_s4 + $0x14] sm:$0xe] }
  0x21   : >> { %v260_v13 = vshrl.u32 %v1175_v9, 16  ;;  %v262_v14 = vshll.u32 %v1175_v9, 16  ;;  %v269_v22 = vrot.slane %v267_v15, 1  ;;  %v579_v23 = vshll.u32 %v1446_v17, 16  ;;  %v1182_v38 = vld [vmem:[%s1825_s1 + $0x8] sm:$0xf] }
  0x22   : >> { %v583_v24 = vshrl.u32 %v1446_v17, 16  ;;  %v572_v25 = vshrl.u32 %v1201_v18, 16  ;;  %v574_v26 = vshll.u32 %v1201_v18, 16  ;;  %v275_v27 = vshll.u32 %v1681_v19, 16  ;;  %v395_v41 = vld [vmem:[%s1668_s4] sm:$0xe] }
  0x23   : >> { %v264_v21 = vrot.slane %v262_v14, 1  ;;  %v1448_v28 = vld [vmem:[%s1668_s4 + $0x24] ss:$0 sps:$4 sm:$0x11]   ;;  %v273_v30 = vor.u32 %v271_v16, %v269_v22  ;;  %v581_v31 = vrot.slane %v579_v23, 1  ;;  %v660_v33 = vrot.slane %v1446_v17, 1 }
  0x24   : >> { %v576_v34 = vrot.slane %v574_v26, 1  ;;  %v277_v35 = vrot.slane %v275_v27, 1  ;;  %v587_v36 = vshll.u32 %v1448_v28, 16  ;;  %v1208_v37 = vcombine.low %v1206_v32, %v1196_v12  ;;  %v1215_v50 = vld [vmem:[%s1825_s1 + $0x18] sm:$0xf]  ;;  %v1451_v62 = vld [vmem:[%s1668_s4 + $0x28] sm:$0xff]  }
  0x25   : >> { %v265_v29 = vor.u32 %v264_v21, %v260_v13  ;;  %v585_v40 = vor.u32 %v583_v24, %v581_v31  ;;  %v1183_v51 = vcombine.low %v395_v41, %v238_v8  ;;  %v403_v53 = vrot.slane %v1673_v10, 1  ;;  %v1220_v54 = vld [vmem:[%s1668_s4 + $0x28] sm:$0xf]  ;;  %v1221_v55 = vld [vmem:[%s1668_s4 + $0x2c] sm:$0xf]  ;;  %v1455_v1 = vld [vmem:[%s1668_s4 + $0x30] sm:$0xff]  }
  0x26   : >> { %v577_v42 = vor.u32 %v576_v34, %v572_v25  ;;  %v278_v43 = vsel %vm258_vm1, %v273_v30, %v277_v35  ;;  %v589_v44 = vrot.slane %v587_v36, 1  ;;  %v659_v45 = vrot.slane %v1208_v37, 1  ;;  %v1190_v60 = vld [vmem:[%s1825_s1 + $0xc] sm:$0xf]  ;;  %v1225_v3 = vld [vmem:[%s1825_s1 + $0x1c] sm:$0xf] }
  0x27   : >> { %v270_v39 = vsel %vm258_vm1, %v265_v29, %v269_v22  ;;  %v402_v52 = vrot.slane %v1183_v51, 1  ;;  %v662_v56 = vrot.slane %v1448_v28, 1  ;;  %v1226_v57 = vcombine.low %v1220_v54, %v1221_v55  ;;  %v1452_v13 = vld [vmem:[%s1668_s4 + $0x30] sm:$0xff]   ;;  %v1457_v14 = vld [vmem:[%s1668_s4 + $0x38] ss:$0 sps:$4 sm:$0x11]  }
  0x28   : >> { %1284 = vmatprep.mubr.msk.bf16.mxu1 %vm279_vm2, %v270_v39  ;;  %v582_v46 = vsel %vm258_vm1, %v577_v42, %v581_v31  ;;  %v590_v47 = vsel %vm258_vm1, %v585_v40, %v589_v44  ;;  %v661_v49 = vsel %vm401_vm3, %v659_v45, %v660_v33  ;;  %v414_v58 = vsel %vm286_vm0, %v1182_v38, 0  ;;  %v1232_v17 = vld [vmem:[%s1825_s1 + $0x20] sm:$0xf]  ;;  %v1231_v18 = vld [vmem:[%s1668_s4 + $0x28] sm:$0xe]  ;;  %s232_s9 = sadd.s32 1, %s1545_s9  }
  0x29   : >> { %1285 = vmatmul.mubr.msk.bf16.vlgmr.msra.gmra.mrb[0].mxu1 %vm279_vm2, %v278_v43  ;;  %1308 = vmatprep.mubr.msk.bf16.mxu0 %vm279_vm2, %v582_v46  ;;  %v404_v59 = vsel %vm401_vm3, %v402_v52, %v403_v53  ;;  %v663_v61 = vsel %vm401_vm3, %v660_v33, %v662_v56  ;;  %v753_v63 = vsel %vm286_vm0, %v1215_v50, 0  ;;  %v831_v2 = vshll.u32 %v1226_v57, 16  ;;  %v1456_v23 = vld [vmem:[%s1668_s4 + $0x1c] sm:$0xff]   ;;  %p229_p12 = scmp.ge.s32.totalorder %s232_s9, 32  }
  0x2a   : >> { %1289 = vmatpush3.bf16.msra.mxu1 %v344_v20  ;;  %1290 = vmatprep.mubr.msk.bf16.mxu1 %vm279_vm2, %v1175_v9  ;;  %v405_v4 = vrot.slane %v1681_v19, 1  ;;  %v829_v5 = vshrl.u32 %v1226_v57, 16  ;;  %v836_v7 = vshll.u32 %v1455_v1, 16  ;;  %v1453_v9 = vld [vmem:[%s1668_s4 + $0x14] sm:$0xff]   ;;  %v496_v12 = vsel %vm286_vm0, %v1190_v60, 0  ;;  %s1015_s4 = scalar_lea.vmem %s210_s8, %s1253_s30 [#allocation2]  ;;  %s1254_s5 = sshll.u32 (%p229_p12), %s1533_s15, 13 }
  0x2b   : >> { %1370 = vmatprep.subr.msk.bf16.mxu1 %vm286_vm0, %v1182_v38  ;;  %1309 = vmatmul.mubr.msk.bf16.vlgmr.msra.gmra.mrb[0].mxu0 %vm279_vm2, %v590_v47  ;;  %v833_v6 = vrot.slane %v831_v2, 1  ;;  %v855_v15 = vsel %vm286_vm0, %v1225_v3, 0  ;;  %v840_v19 = vshrl.u32 %v1455_v1, 16  ;;  %v844_v20 = vshll.u32 %v1457_v14, 16  ;;  %s1770_s11 = scalar_lea.hbm (%p229_p12), %s1827_s3, %s1254_s5  ;;  %s1039_s18 = sshll.u32 (%p229_p12), %s210_s8, 4  ;;  %s1774_s18 = int_to_ptr.vmem [resolvable:$true] %s1039_s18 }
  0x2c   : >> { %1313 = vmatpush3.bf16.msra.mxu0 %v671_v48  ;;  %1314 = vmatprep.mubr.msk.bf16.mxu0 %vm279_vm2, %v661_v49  ;;  %v406_v8 = vsel %vm401_vm3, %v403_v53, %v405_v4  ;;  %v838_v11 = vrot.slane %v836_v7, 1  ;;  %v1233_v21 = vcombine.low %v1231_v18, %v1221_v55  ;;  %v917_v26 = vrot.slane %v1455_v1, 1  ;;  %s1778_s9 = scalar_lea.sflag (%p229_p12), [#allocation3], %s208_s26  ;;  %s1459_s7 = scalar_lea.vmem (%p229_p12), %s1774_s18, 8192 }
  0x2d   : >> { %1374 = vmatprep.subr.msk.bf16.mxu0 %vm286_vm0, %v1215_v50  ;;  %v846_v24 = vrot.slane %v844_v20, 1  ;;  %v928_v28 = vsel %vm286_vm0, %v1232_v17, 0  ;;  %v919_v30 = vrot.slane %v1457_v14, 1  ;;  %vm1016_vm4 = vcmask 519168   ;;  %p1460_p13 = scmp.ne.s32.totalorder (%p229_p12), %s1774_s18, %s1459_s7  ;;  %s1547_s15 = smov (%p229_p12), [#allocation2]  }
  0x2e   : >> { %v842_v22 = vor.u32 %v840_v19, %v838_v11  ;;  %v916_v25 = vrot.slane %v1233_v21, 1  ;;  %s1463_s19 = sshll.u32 (%p229_p12), %s1547_s15, 4  ;;  %s1464_s19 = int_to_ptr.vmem [resolvable:$false] %s1463_s19 }
  0x2f   : >> { %v920_v31 = vsel %vm401_vm3, %v917_v26, %v919_v30  ;;  %p1461_p0 = pnand (%p229_p12), %p1460_p13, %p1610_p4  ;;  %s1465_s21 = scalar_lea.vmem (%p229_p12), %s1464_s19, 16384 }
  0x30   : >> { %v847_v27 = vsel %vm258_vm1, %v842_v22, %v846_v24  ;;  %v918_v29 = vsel %vm401_vm3, %v916_v25, %v917_v26  ;;  %p1466_p2 = scmp.lt.s32.totalorder (%p229_p12), %s1774_s18, %s1464_s19  ;;  %p1467_p3 = scmp.lt.s32.totalorder (%p229_p12), %s1465_s21, %s1459_s7 }
  0x31   : > { %p1462_p1 = pneg (%p229_p12), %p1461_p0 }
  0x32   : > { %p1468_p5 = por (%p229_p12), %p1467_p3, %p1466_p2 }
  0x34   : > { %p1469_p6 = pnand (%p229_p12), %p1468_p5, %p1462_p1 }
  0x35   : >> { %1291 = vmatmul.mubr.msk.bf16.vlgmr.msra.gmra.mrb[0].mxu1 %vm279_vm2, %v1673_v10  ;;  %v834_v10 = vor.u32 %v833_v6, %v829_v5 }
  0x36   : >> { %1295 = vmatpush3.bf16.msra.mxu1 %v414_v58  ;;  %1296 = vmatprep.mubr.msk.bf16.mxu1 %vm279_vm2, %v404_v59 }
  0x37   : >> { %1371 = vmatprep.subr.msk.bf16.mxu1 %vm286_vm0, %v1190_v60  ;;  %1315 = vmatmul.mubr.msk.bf16.vlgmr.msra.gmra.mrb[0].mxu0 %vm279_vm2, %v663_v61  ;;  %v839_v16 = vsel %vm258_vm1, %v834_v10, %v838_v11 }
  0x38   : >> { %1319 = vmatpush3.bf16.msra.mxu0 %v753_v63  ;;  %1320 = vmatprep.mubr.msk.bf16.mxu0 %vm279_vm2, %v1451_v62 }
  0x39   : >> { %1375 = vmatprep.subr.msk.bf16.mxu0 %vm286_vm0, %v1225_v3 }
  0x41   : >> { %1297 = vmatmul.mubr.msk.bf16.vlgmr.msra.gmra.mrb[0].mxu1 %vm279_vm2, %v406_v8 }
  0x42   : >> { %1301 = vmatpush3.bf16.msra.mxu1 %v496_v12  ;;  %1302 = vmatprep.mubr.msk.bf16.mxu1 %vm279_vm2, %v1453_v9 }
  0x43   : >> { %1321 = vmatmul.mubr.msk.bf16.vlgmr.msra.gmra.mrb[0].mxu0 %vm279_vm2, %v1452_v13 }
  0x44   : >> { %1325 = vmatpush3.bf16.msra.mxu0 %v855_v15  ;;  %1326 = vmatprep.mubr.msk.bf16.mxu0 %vm279_vm2, %v839_v16 }
  0x45   : >> { %1376 = vmatprep.subr.msk.bf16.mxu0 %vm286_vm0, %v1232_v17 }
  0x4d   : >> { %1303 = vmatmul.mubr.msk.bf16.vlgmr.msra.gmra.mrb[0].mxu1 %vm279_vm2, %v1456_v23 }
  0x4f   : >> { %1327 = vmatmul.mubr.msk.bf16.vlgmr.msra.gmra.mrb[0].mxu0 %vm279_vm2, %v847_v27 }
  0x50   : >> { %1331 = vmatpush3.bf16.msra.mxu0 %v928_v28  ;;  %1332 = vmatprep.mubr.msk.bf16.mxu0 %vm279_vm2, %v918_v29 }
  0x5b   : >> { %1333 = vmatmul.mubr.msk.bf16.vlgmr.msra.gmra.mrb[0].mxu0 %vm279_vm2, %v920_v31 }
 0x120   : >> { %v1304_v32 = vpop.f32.mrb[0].mxu1 }
 0x121   : >> { %v532_v33 = vpop.f32.mrb[1].mxu1 }
 0x122   : >> { %v1305_v34 = vpop.f32.mrb[2].mxu1 }
 0x123   : >> { %v535_v35 = vpop.f32.mrb[3].mxu1 }
 0x12e   : >> { %v1334_v36 = vpop.f32.mrb[0].mxu0 }
 0x12f   : >> { %v1336_v37 = vadd.f32 %v1334_v36, %v1304_v32  ;;  %v964_v38 = vpop.f32.mrb[1].mxu0 }
 0x130   : >> { %v1337_v39 = vadd.f32 %v964_v38, %v532_v33  ;;  %v1335_v40 = vpop.f32.mrb[2].mxu0 }
 0x131   : >> { %v991_v41 = vadd.f32 %v1336_v37, %v1630_v0  ;;  %v1338_v42 = vadd.f32 %v1335_v40, %v1305_v34  ;;  %v967_v43 = vpop.f32.mrb[3].mxu0 }
 0x132   : >> { %v989_v44 = vadd.f32 %v1337_v39, %v1630_v0  ;;  %v1339_v45 = vadd.f32 %v967_v43, %v535_v35 }
 0x133   : >> { %v995_v46 = vmax.f32 %v991_v41, 0.0  ;;  %v992_v47 = vadd.f32 %v1338_v42, %v1630_v0 }
 0x134   : >> { %v993_v48 = vmax.f32 %v989_v44, 0.0  ;;  %v990_v49 = vadd.f32 %v1339_v45, %v1630_v0  ;;  %231 = sbr.rel (!%p229_p12) target bundleno = 27 (0x1b), region = 92 }
 0x135   : >> { %v1251_v50 = vpack.c.bf16 %v995_v46, %v995_v46  ;;  %v996_v51 = vmax.f32 %v992_v47, 0.0 }
 0x136   : >> { %v1249_v52 = vpack.c.bf16 %v993_v48, %v993_v48  ;;  %v994_v53 = vmax.f32 %v990_v49, 0.0 }
 0x137   : >> { %1019 = vst.msk [vmem:[%s1015_s4 + $0x8] sm:$0xf] %vm1016_vm4, %v1251_v50  ;;  %v1252_v54 = vpack.c.bf16 %v996_v51, %v996_v51 }
 0x138   : >> { %1017 = vst.msk [vmem:[%s1015_s4] sm:$0xf] %vm1016_vm4, %v1249_v52  ;;  %v1250_v55 = vpack.c.bf16 %v994_v53, %v994_v53 }
 0x139   : >> { %1020 = vst.msk [vmem:[%s1015_s4 + $0xc] sm:$0xf] %vm1016_vm4, %v1252_v54 }
 0x13a   : >> { %1018 = vst.msk [vmem:[%s1015_s4 + $0x4] sm:$0xf] %vm1016_vm4, %v1250_v55 }
 0x13b   : > { %1472 = shalt.err (!%p1469_p6)
}
 0x13c   : > { %s1473_s26 = scalar_lea.hbm %s1770_s11, 8192  ;;  %s1477_s23 = scalar_lea.hbm %s1827_s3, 32768 }
 0x13d   : > { %p1474_p7 = scmp.ne.s32.totalorder %s1770_s11, %s1473_s26  ;;  %p1478_p11 = scmp.lt.u32.totalorder %s1770_s11, %s1827_s3 }
 0x13e   : > { %p1479_p12 = scmp.lt.u32.totalorder %s1477_s23, %s1473_s26  ;;  %p1481_p0 = scmp.lt.u32.totalorder %s1473_s26, %s1770_s11 }
 0x13f   : > { %p1475_p9 = pnand %p1474_p7, %p1610_p4 }
 0x140   : > { %p1480_p13 = por %p1479_p12, %p1478_p11 }
 0x141   : > { %p1476_p10 = pneg %p1475_p9 }
 0x142   : > { %p1482_p1 = por %p1481_p0, %p1480_p13 }
 0x144   : > { %p1483_p2 = pnand %p1482_p1, %p1476_p10 }
 0x146   : > { %1486 = shalt.err (!%p1483_p2)
}
 0x147   : > { %s1548_s30 = smov 64   ;;  %s1549_s4 = smov 4  }
 0x148   : > { %1378 = dma.vmem_to_hbm [thread:$0]  (%p1610_p4), %s1774_s18, 8192, %s1770_s11, %s1778_s9, %s1548_s30, %s1548_s30, %s1549_s4  }
 0x149 PF: > { %p1384_p3 = scmp.ge.s32.totalorder %s1541_s17, 2  ;;  %s1054_s5 = sand.u32 1, %s1521_s12  }
 0x14a   : > { %s1055_s6 = scalar_lea.sflag [#allocation3], %s1054_s5 }
 0x14b   : > { %p1381_p5 = pnand %p1384_p3, %p1617_p8 }
 0x14d   : > { %1516 = dma.done.wait (!%p1381_p5), %s1055_s6, 8192  }
 0x14e   : > { %1518 = vsyncadd (!%p1381_p5), %s1055_s6, 4294959104  ;;  %s16_s17 = sadd.s32 1, %s1541_s17   ;;  %s1830_s12 = smov %s1525_s13 }
 0x14f   : > { %p13_p6 = scmp.ge.s32.totalorder %s16_s17, 6   ;;  %s1831_s13 = smov %s1529_s14 }
 0x150   : > { %s1832_s14 = smov %s1623_s25  ;;  %s1833_s15 = smov %s1537_s16 }
 0x151   : > { %s1834_s16 = smov %s1836_s20  ;;  %15 = sbr.rel (!%p13_p6) target bundleno = 4 (0x4), region = 103 }
 0x158   :  { %1060 = vsyncpa [#allocation3], 1 }
 0x159   :  { %1062 = vsyncpa [#allocation3 + $0x1], 1 }

</bundles_post_ra>
